<compile_context>
chip_gen: v6e
topology: v6e:2x2x1
jax: 0.10.0
libtpu: 0.0.40
codegen_flags: <defaults>
</compile_context>

<pallas_src>
import math

import jax
import jax.numpy as jnp
from jax.experimental import pallas as pl
from jax.experimental.pallas import tpu as pltpu


def parallel_sum_kernel(x_ref, wcb_ref, whw_ref, bias_ref, o_ref):
    # x_ref   : (tb*C, HW)     flattened rows of tb batches (lane-dense HW)
    # wcb_ref : (tb*C, tb*C)   block-diagonal kron(I_tb, Wc^T)  (channel mix)
    # whw_ref : (HW,  tn)      panel of kron(Wh, I_W) + kron(I_H, Ww)
    # bias_ref: (tb*C, tn)     folded (bc + bh + bw) panel, f32
    # o_ref   : (tb*C, tn)     output panel
    tn = o_ref.shape[-1]
    x_blk = x_ref[...]

    # Combined height+width mix: one big lane-contraction MXU matmul, f32 acc.
    acc = jnp.dot(x_blk, whw_ref[...], preferred_element_type=jnp.float32)

    # Channel mix: one block-diagonal left matmul on this output panel's lanes.
    if x_ref.shape[-1] == tn:          # single output panel: use the full block
        x_panel = x_blk
    else:                              # tn is a multiple of 128 by construction
        start = pl.multiple_of(pl.program_id(1) * tn, 128)
        x_panel = x_ref[:, pl.ds(start, tn)]
    acc = acc + jnp.dot(wcb_ref[...], x_panel, preferred_element_type=jnp.float32)

    # Folded bias, added exactly once per block.
    acc = acc + bias_ref[...]
    o_ref[...] = acc.astype(o_ref.dtype)


def _round_up(a, b):
    return ((a + b - 1) // b) * b


def parallel_sum(x, wc, bc, wh, bh, ww, bw, *, tb=None, compute_dtype=None):
    B, C, H, W = x.shape
    HW = H * W
    out_dtype = x.dtype
    op_dtype = jnp.dtype(compute_dtype) if compute_dtype is not None else jnp.dtype(x.dtype)
    op_size = op_dtype.itemsize

    # ---- generation-aware VMEM budget (v5e/v6e: 128 MiB, v7x: 64 MiB) ----
    try:
        vmem_cap = int(pltpu.get_tpu_info().vmem_capacity_bytes)
    except Exception:
        vmem_cap = 64 * 1024 * 1024                 # conservative fallback
    vmem_budget = (vmem_cap * 2) // 5               # tile-sizing budget (~40%)
    vmem_limit = vmem_cap // 2                      # scoped limit handed to Mosaic

    # ---- output-lane (HW) panelling: tn | HW, multiple of 128 ----
    tn_cands = [d for d in range(128, HW + 1, 128) if HW % d == 0] or [HW]
    tn = None
    for cand in sorted(tn_cands, reverse=True):
        if 2 * HW * cand * op_size <= vmem_budget // 4:   # double-buffered panel
            tn = cand
            break
    if tn is None:
        tn = min(tn_cands)

    # ---- row blocking: tb batches (tb*C rows) per grid step ----
    sub = 8 // math.gcd(C, 8)                       # smallest tb with tb*C % 8 == 0
    target_tb = max(sub, _round_up(max(1, 256 // C), sub))   # ~full MXU M tile

    def vmem_needed(tb_):
        m = tb_ * C
        return (2 * m * HW * op_size        # x tile (double-buffered)
                + 2 * m * tn * op_size      # out tile (double-buffered)
                + m * m * op_size           # kron(I_tb, Wc^T) (single-buffered)
                + 2 * HW * tn * op_size     # W_hw panel
                + 2 * m * tn * 4)           # folded f32 bias panel

    if tb is None:
        tb = sub
        hi = min(target_tb, _round_up(B, sub))
        for cand in range(hi, sub - 1, -sub):
            if vmem_needed(cand) <= vmem_budget:
                tb = cand
                break
    else:
        tb = max(sub, _round_up(tb, sub))

    # Rebalance so the zero-padded last block wastes as little as possible.
    n_row = pl.cdiv(B, tb)
    tb = max(sub, _round_up(pl.cdiv(B, n_row), sub))
    n_row = pl.cdiv(B, tb)
    m_blk = tb * C

    # Tiny-batch case: guarantee >=2 "parallel" grid steps so a v7x megacore
    # can shard the grid (no effect on single-TC v5e/v6e).
    if n_row == 1 and HW // tn < 2:
        smaller = [d for d in tn_cands if d < HW]
        if smaller:
            tn = max(smaller)
    n_col = HW // tn

    # ---- wrapper-side operator folding (batch-invariant, built in f32) ----
    f32 = jnp.float32
    whw = (jnp.kron(wh.astype(f32), jnp.eye(W, dtype=f32))
           + jnp.kron(jnp.eye(H, dtype=f32), ww.astype(f32)))          # (HW, HW)
    wcb = jnp.kron(jnp.eye(tb, dtype=f32), wc.T.astype(f32))           # (m_blk, m_blk)
    bias = (bc[:, None, None].astype(f32)
            + bh[None, :, None].astype(f32)
            + bw[None, None, :].astype(f32)).reshape(C, HW)
    bias = jnp.tile(bias, (tb, 1))                                     # (m_blk, HW), f32

    whw = whw.astype(op_dtype)
    wcb = wcb.astype(op_dtype)

    x2 = x.reshape(B * C, HW).astype(op_dtype)                         # lane-dense rows
    rows_pad = n_row * m_blk
    if rows_pad != B * C:
        x2 = jnp.pad(x2, ((0, rows_pad - B * C), (0, 0)))              # whole fake batches

    def call(weight_mode):
        def spec(shape, index_map, constant):
            if constant and weight_mode is not None:
                return pl.BlockSpec(shape, index_map, pipeline_mode=weight_mode)
            return pl.BlockSpec(shape, index_map)

        return pl.pallas_call(
            parallel_sum_kernel,
            out_shape=jax.ShapeDtypeStruct((rows_pad, HW), out_dtype),
            grid=(n_row, n_col),
            in_specs=[
                spec((m_blk, HW), lambda i, j: (i, 0), False),         # x rows
                spec((m_blk, m_blk), lambda i, j: (0, 0), True),       # kron(I_tb, Wc^T)
                spec((HW, tn), lambda i, j: (0, j), n_col == 1),       # W_hw panel
                spec((m_blk, tn), lambda i, j: (0, j), n_col == 1),    # folded bias panel
            ],
            out_specs=pl.BlockSpec((m_blk, tn), lambda i, j: (i, j)),
            compiler_params=pltpu.CompilerParams(
                dimension_semantics=("parallel", "parallel"),
                vmem_limit_bytes=vmem_limit,
            ),
        )(x2, wcb, whw, bias)

    try:
        # Batch-invariant operands are only DMA'd once: single-buffer them.
        out2 = call(pl.Buffered(1))
    except Exception:
        # pipeline_mode / Buffered(1) unsupported on this JAX build: fall back
        # to default double-buffering (identical results, slightly more VMEM).
        out2 = call(None)

    return out2[:B * C].reshape(B, C, H, W)


def reference(x, wc, bc, wh, bh, ww, bw):
    y_c = jnp.einsum('bchw,cd->bdhw', x, wc) + bc[None, :, None, None]
    y_h = jnp.einsum('bchw,hk->bckw', x, wh) + bh[None, None, :, None]
    y_w = jnp.einsum('bchw,wk->bchk', x, ww) + bw[None, None, None, :]
    return y_c + y_h + y_w


if __name__ == "__main__":
    B, C, H, W = 2, 4, 16, 16

    key = jax.random.PRNGKey(0)
    kx, kwc, kbc, kwh, kbh, kww, kbw = jax.random.split(key, 7)

    x = jax.random.normal(kx, (B, C, H, W), dtype=jnp.float32)
    # Deterministic parameter init (Linear-style fan-in scaling).
    wc = jax.random.normal(kwc, (C, C), dtype=jnp.float32) / jnp.sqrt(C)
    bc = jax.random.normal(kbc, (C,), dtype=jnp.float32) * 0.1
    wh = jax.random.normal(kwh, (H, H), dtype=jnp.float32) / jnp.sqrt(H)
    bh = jax.random.normal(kbh, (H,), dtype=jnp.float32) * 0.1
    ww = jax.random.normal(kww, (W, W), dtype=jnp.float32) / jnp.sqrt(W)
    bw = jax.random.normal(kbw, (W,), dtype=jnp.float32) * 0.1

    ref = reference(x, wc, bc, wh, bh, ww, bw)

    # f32 operands (exact path).
    out = jax.block_until_ready(parallel_sum(x, wc, bc, wh, bh, ww, bw))
    assert out.shape == (B, C, H, W)
    assert jnp.allclose(out, ref, atol=1e-3, rtol=1e-3), "f32 mismatch vs reference"

    # bf16 operands + f32 accumulation (MXU-native production fast path).
    out_bf16 = jax.block_until_ready(
        parallel_sum(x, wc, bc, wh, bh, ww, bw, compute_dtype=jnp.bfloat16))
    assert out_bf16.shape == (B, C, H, W)
    assert jnp.allclose(out_bf16, ref, atol=5e-2, rtol=5e-2), "bf16 mismatch vs reference"

    print("KERNEL_OK")
</pallas_src>

<mosaic_0001>
module attributes {stable_mosaic.version = 11 : i64} {
  func.func @parallel_sum_kernel(%arg0: i32, %arg1: i32, %arg2: memref<8x256xf32, #tpu.memory_space<vmem>>, %arg3: memref<8x8xf32, #tpu.memory_space<vmem>>, %arg4: memref<256x128xf32, #tpu.memory_space<vmem>>, %arg5: memref<8x128xf32, #tpu.memory_space<vmem>>, %arg6: memref<8x128xf32, #tpu.memory_space<vmem>>) attributes {dimension_semantics = [#tpu.dimension_semantics<parallel>, #tpu.dimension_semantics<parallel>], iteration_bounds = array<i64: 1, 2>, scalar_prefetch = 0 : i64, scratch_operands = 0 : i64, tpu.core_type = #tpu.core_type<tc>, window_params = [{transform_indices = @transform_0, window_bounds = array<i64: 8, 256>}, {pipeline_mode = #tpu.pipeline_mode<synchronous>, transform_indices = @transform_1, window_bounds = array<i64: 8, 8>}, {transform_indices = @transform_2, window_bounds = array<i64: 256, 128>}, {transform_indices = @transform_3, window_bounds = array<i64: 8, 128>}, {transform_indices = @transform_4, window_bounds = array<i64: 8, 128>}]} {
    %c0 = arith.constant 0 : index
    %c0_0 = arith.constant 0 : index
    %0 = vector.load %arg2[%c0, %c0_0] : memref<8x256xf32, #tpu.memory_space<vmem>>, vector<8x256xf32>
    %c0_1 = arith.constant 0 : index
    %c0_2 = arith.constant 0 : index
    %1 = vector.load %arg4[%c0_1, %c0_2] : memref<256x128xf32, #tpu.memory_space<vmem>>, vector<256x128xf32>
    %cst = arith.constant dense<0.000000e+00> : vector<8x128xf32>
    %2 = tpu.matmul %0, %1, %cst {dimension_numbers = #tpu.dot_dimension_numbers<[1], [0], [0], [1], [0, 0, 1, 1], [], []>} : vector<8x256xf32>, vector<256x128xf32>, vector<8x128xf32> -> vector<8x128xf32>
    %c128_i32 = arith.constant 128 : i32
    %3 = arith.muli %arg1, %c128_i32 : i32
    %4 = tpu.assume_multiple %3, 128 : i32
    %c0_3 = arith.constant 0 : index
    %5 = arith.index_cast %4 : i32 to index
    %6 = vector.load %arg2[%c0_3, %5] : memref<8x256xf32, #tpu.memory_space<vmem>>, vector<8x128xf32>
    %c0_4 = arith.constant 0 : index
    %c0_5 = arith.constant 0 : index
    %7 = vector.load %arg3[%c0_4, %c0_5] : memref<8x8xf32, #tpu.memory_space<vmem>>, vector<8x8xf32>
    %cst_6 = arith.constant dense<0.000000e+00> : vector<8x128xf32>
    %8 = tpu.matmul %7, %6, %cst_6 {dimension_numbers = #tpu.dot_dimension_numbers<[1], [0], [0], [1], [0, 0, 1, 1], [], []>} : vector<8x8xf32>, vector<8x128xf32>, vector<8x128xf32> -> vector<8x128xf32>
    %9 = arith.addf %2, %8 : vector<8x128xf32>
    %c0_7 = arith.constant 0 : index
    %c0_8 = arith.constant 0 : index
    %10 = vector.load %arg5[%c0_7, %c0_8] : memref<8x128xf32, #tpu.memory_space<vmem>>, vector<8x128xf32>
    %11 = arith.addf %9, %10 : vector<8x128xf32>
    %c0_9 = arith.constant 0 : index
    %c0_10 = arith.constant 0 : index
    %12 = vector.load %arg6[%c0_9, %c0_10] : memref<8x128xf32, #tpu.memory_space<vmem>>, vector<8x128xf32>
    tpu.vector_store %arg6[%c0_9, %c0_10], %11 {strides = array<i32>} : memref<8x128xf32, #tpu.memory_space<vmem>>, vector<8x128xf32>,
    return
  }
  func.func @transform_0(%arg0: i32, %arg1: i32) -> (i32, i32) {
    %c0_i32 = arith.constant 0 : i32
    %c0_i32_0 = arith.constant 0 : i32
    return %arg0, %c0_i32 : i32, i32
  }
  func.func @transform_1(%arg0: i32, %arg1: i32) -> (i32, i32) {
    %c0_i32 = arith.constant 0 : i32
    %c0_i32_0 = arith.constant 0 : i32
    %c0_i32_1 = arith.constant 0 : i32
    return %c0_i32, %c0_i32_0 : i32, i32
  }
  func.func @transform_2(%arg0: i32, %arg1: i32) -> (i32, i32) {
    %c0_i32 = arith.constant 0 : i32
    %c0_i32_0 = arith.constant 0 : i32
    return %c0_i32, %arg1 : i32, i32
  }
  func.func @transform_3(%arg0: i32, %arg1: i32) -> (i32, i32) {
    %c0_i32 = arith.constant 0 : i32
    %c0_i32_0 = arith.constant 0 : i32
    return %c0_i32, %arg1 : i32, i32
  }
  func.func @transform_4(%arg0: i32, %arg1: i32) -> (i32, i32) {
    %c0_i32 = arith.constant 0 : i32
    return %arg0, %arg1 : i32, i32
  }
}

module attributes {stable_mosaic.version = 11 : i64} {
  func.func @parallel_sum_kernel(%arg0: i32, %arg1: i32, %arg2: memref<8x256xf32, #tpu.memory_space<vmem>>, %arg3: memref<8x8xf32, #tpu.memory_space<vmem>>, %arg4: memref<256x128xf32, #tpu.memory_space<vmem>>, %arg5: memref<8x128xf32, #tpu.memory_space<vmem>>, %arg6: memref<8x128xf32, #tpu.memory_space<vmem>>) attributes {dimension_semantics = [#tpu.dimension_semantics<parallel>, #tpu.dimension_semantics<parallel>], iteration_bounds = array<i64: 1, 2>, scalar_prefetch = 0 : i64, scratch_operands = 0 : i64, tpu.core_type = #tpu.core_type<tc>, window_params = [{transform_indices = @transform_0, window_bounds = array<i64: 8, 256>}, {pipeline_mode = #tpu.pipeline_mode<synchronous>, transform_indices = @transform_1, window_bounds = array<i64: 8, 8>}, {transform_indices = @transform_2, window_bounds = array<i64: 256, 128>}, {transform_indices = @transform_3, window_bounds = array<i64: 8, 128>}, {transform_indices = @transform_4, window_bounds = array<i64: 8, 128>}]} {
    %c0 = arith.constant 0 : index
    %c0_0 = arith.constant 0 : index
    %0 = vector.load %arg2[%c0, %c0_0] : memref<8x256xf32, #tpu.memory_space<vmem>>, vector<8x256xf32>
    %c0_1 = arith.constant 0 : index
    %c0_2 = arith.constant 0 : index
    %1 = vector.load %arg4[%c0_1, %c0_2] : memref<256x128xf32, #tpu.memory_space<vmem>>, vector<256x128xf32>
    %cst = arith.constant dense<0.000000e+00> : vector<8x128xf32>
    %2 = tpu.matmul %0, %1, %cst {dimension_numbers = #tpu.dot_dimension_numbers<[1], [0], [0], [1], [0, 0, 1, 1], [], []>} : vector<8x256xf32>, vector<256x128xf32>, vector<8x128xf32> -> vector<8x128xf32>
    %c128_i32 = arith.constant 128 : i32
    %3 = arith.muli %arg1, %c128_i32 : i32
    %4 = tpu.assume_multiple %3, 128 : i32
    %c0_3 = arith.constant 0 : index
    %5 = arith.index_cast %4 : i32 to index
    %6 = vector.load %arg2[%c0_3, %5] : memref<8x256xf32, #tpu.memory_space<vmem>>, vector<8x128xf32>
    %c0_4 = arith.constant 0 : index
    %c0_5 = arith.constant 0 : index
    %7 = vector.load %arg3[%c0_4, %c0_5] : memref<8x8xf32, #tpu.memory_space<vmem>>, vector<8x8xf32>
    %cst_6 = arith.constant dense<0.000000e+00> : vector<8x128xf32>
    %8 = tpu.matmul %7, %6, %cst_6 {dimension_numbers = #tpu.dot_dimension_numbers<[1], [0], [0], [1], [0, 0, 1, 1], [], []>} : vector<8x8xf32>, vector<8x128xf32>, vector<8x128xf32> -> vector<8x128xf32>
    %9 = arith.addf %2, %8 : vector<8x128xf32>
    %c0_7 = arith.constant 0 : index
    %c0_8 = arith.constant 0 : index
    %10 = vector.load %arg5[%c0_7, %c0_8] : memref<8x128xf32, #tpu.memory_space<vmem>>, vector<8x128xf32>
    %11 = arith.addf %9, %10 : vector<8x128xf32>
    %c0_9 = arith.constant 0 : index
    %c0_10 = arith.constant 0 : index
    %12 = vector.load %arg6[%c0_9, %c0_10] : memref<8x128xf32, #tpu.memory_space<vmem>>, vector<8x128xf32>
    tpu.vector_store %arg6[%c0_9, %c0_10], %11 {strides = array<i32>} : memref<8x128xf32, #tpu.memory_space<vmem>>, vector<8x128xf32>,
    return
  }
  func.func @transform_0(%arg0: i32, %arg1: i32) -> (i32, i32) {
    %c0_i32 = arith.constant 0 : i32
    %c0_i32_0 = arith.constant 0 : i32
    return %arg0, %c0_i32 : i32, i32
  }
  func.func @transform_1(%arg0: i32, %arg1: i32) -> (i32, i32) {
    %c0_i32 = arith.constant 0 : i32
    %c0_i32_0 = arith.constant 0 : i32
    %c0_i32_1 = arith.constant 0 : i32
    return %c0_i32, %c0_i32_0 : i32, i32
  }
  func.func @transform_2(%arg0: i32, %arg1: i32) -> (i32, i32) {
    %c0_i32 = arith.constant 0 : i32
    %c0_i32_0 = arith.constant 0 : i32
    return %c0_i32, %arg1 : i32, i32
  }
  func.func @transform_3(%arg0: i32, %arg1: i32) -> (i32, i32) {
    %c0_i32 = arith.constant 0 : i32
    %c0_i32_0 = arith.constant 0 : i32
    return %c0_i32, %arg1 : i32, i32
  }
  func.func @transform_4(%arg0: i32, %arg1: i32) -> (i32, i32) {
    %c0_i32 = arith.constant 0 : i32
    return %arg0, %arg1 : i32, i32
  }
}

</mosaic_0001>

<bundles_post_ra>
// kernel: tpu_custom_call.1
= control target key start
LH: loop header
LB: loop body
LE: loop exit
PB: predicated region body
PF: predicated region fallthrough
CT: control target
= control target key end

     0   :  { %s1259_s0 = inlined_call_operand.hbm [shape: f32[8,256], index: 0, kind: input, shape index: {}]   ;;  %s1260_s1 = inlined_call_operand.hbm [shape: f32[8,8], index: 1, kind: input, shape index: {}]   ;;  %s1261_s2 = inlined_call_operand.hbm [shape: f32[256,256], index: 2, kind: input, shape index: {}]   ;;  %s1262_s3 = inlined_call_operand.hbm [shape: f32[8,256], index: 3, kind: input, shape index: {}]   ;;  %s1263_s4 = inlined_call_operand.hbm [shape: f32[8,256], index: 4, kind: output, shape index: {}]  }
   0x1   :  { %1267 = sst [smem:[#allocation15_spill]] %s1259_s0 }
   0x2   :  { %1268 = sst [smem:[#allocation16_spill]] %s1261_s2 }
   0x3   :  { %9 = vsyncpa [#allocation3], 0 }
   0x4   :  { %10 = vsyncpa [#allocation6], 0 }
   0x5   :  { %11 = vsyncpa [#allocation4], 0 }
   0x6   :  { %13 = vsyncpa [#allocation4 + $0x1], 0  ;;  %s1012_s15 = smov 0   ;;  %s1014_s16 = smov 0  }
   0x7   :  { %s1016_s17 = smov 0   ;;  %s1018_s18 = smov 0  }
   0x8   :  { %s1020_s19 = smov 0   ;;  %s1022_s20 = smov 0  }
   0x9 LB: > { %s1043_s21 = sadd.s32 4294967295, %s975_s20   ;;  %s622_s22 = sadd.s32 4294967294, %s975_s20   ;;  %s975_s20 = sphi %s1022_s20, %s19_s20   ;;  %s971_s19 = sphi %s1020_s19, %s1288_s19   ;;  %s967_s18 = sphi %s1018_s18, %s1287_s18   ;;  %s963_s17 = sphi %s1016_s17, %s1286_s17   ;;  %s959_s16 = sphi %s1014_s16, %s1285_s16   ;;  %s955_s15 = sphi %s1012_s15, %s1284_s15  }
   0xa   : > { %s85_s23 = sadd.s32 1, %s963_s17  ;;  %p92_p0 = scmp.ne.s32.totalorder %s963_s17, %s959_s16 }
   0xb   : > { %p93_p1 = scmp.eq.s32.totalorder %s975_s20, 0  ;;  %p98_p2 = scmp.ne.s32.totalorder %s959_s16, %s955_s15 }
   0xc   : > { %p99_p3 = scmp.eq.s32.totalorder %s1043_s21, 0  ;;  %p150_p4 = scmp.eq.s32.totalorder %s1043_s21, 1 }
   0xd   : > { %p1054_p5 = por %p93_p1, %p92_p0  ;;  %p156_p6 = scmp.eq.s32.totalorder %s622_s22, 1 }
   0xe   : > { %p1060_p7 = por %p99_p3, %p98_p2  ;;  %p1064_p8 = por %p150_p4, %p92_p0 }
   0xf   : > { %p1068_p9 = por %p156_p6, %p98_p2  ;;  %p623_p10 = scmp.ge.s32.totalorder %s975_s20, 1 }
  0x10   : > { %s1271_s26 = scalar_select %p1064_p8, 1, 0 }
  0x11   : > { %s1272_s27 = scalar_select %p1068_p9, 1, 0 }
  0x12   : > { %p163_p11 = scmp.lt.s32.totalorder %s975_s20, 3  ;;  %s977_s29 = smov [#allocation2]  }
  0x13   : > { %s179_s30 = sshll.u32 %s977_s29, 4  ;;  %p720_p1 = scmp.lt.s32.totalorder %s975_s20, 2  ;;  %s180_s30 = int_to_ptr.vmem [resolvable:$true] %s179_s30 }
  0x14   : > { %p1075_p13 = pnand %p623_p10, %p163_p11  ;;  %s28_s7 = sadd.s32 1, %s971_s19 }
  0x15   : > { %p1084_p4 = pnand %p720_p1, %p1054_p5  ;;  %p29_p6 = scmp.ge.s32.totalorder %s28_s7, 2 }
  0x16   : > { %p700_p0 = pneg %p1075_p13  ;;  %s201_s8 = sand.u32 1, %s975_s20  }
  0x17   : > { %s790_s9 = scalar_lea.vmem %s180_s30, 256  ;;  %p798_p12 = scmp.lt.s32.totalorder %s180_s30, %s180_s30 }
  0x18   : > { %p1090_p2 = pnand %p700_p0, %p99_p3  ;;  %p791_p11 = scmp.ne.s32.totalorder %s180_s30, %s790_s9 }
  0x19   : > { %p799_p9 = scmp.lt.s32.totalorder %s790_s9, %s790_s9 }
  0x1a   : > { %p781_p10 = pneg %p1090_p2 }
  0x1b   : > { %p800_p8 = por %p799_p9, %p798_p12 }
  0x1c   : > { %p793_p5 = pnand %p791_p11, %p781_p10 }
  0x1e   : > { %p794_p1 = pneg %p793_p5 }
  0x20   : > { %p801_p0 = pnand %p800_p8, %p794_p1 }
  0x22   : > { %804 = shalt.err (!%p801_p0)
}
  0x23   : > { %s1276_s0 = sld [smem:[#allocation15_spill]]  ;;  %s1290_s7 = smov (%p29_p6, %s28_s7), 0 }
  0x24   : > { %1277 = sst [smem:[#allocation14_spill]] %s1290_s7  ;;  %s203_s12 = sand.u32 1, %s963_s17  }
  0x25   : > { %s82_s13 = ssub.s32 %s971_s19, %s1290_s7  ;;  %s627_s14 = sshll.u32 %s203_s12, 8 }
  0x26   : > { %p83_p8 = scmp.eq.s32.totalorder %s82_s13, 0  ;;  %s1266_s22 = sshll.u32 %s971_s19, 7 }
  0x27   : > { %s205_s24 = scalar_lea.vmem [#allocation7], %s627_s14  ;;  %s1278_s2 = sld [smem:[#allocation16_spill]] }
  0x28   : > { %s211_s29 = sshll.u32 %s205_s24, 4  ;;  %p807_p9 = pneg %p1084_p4  ;;  %s212_s29 = int_to_ptr.vmem [resolvable:$true] %s211_s29 }
  0x29   : > { %703 = dma.hbm_to_vmem [thread:$0]  (!%p1090_p2), %s1276_s0, 256, %s180_s30, [#allocation3]  }
  0x2a   : > { %s1117_s9 = scalar_select %p83_p8, %s963_s17, %s85_s23  }
  0x2b   : > { %s1124_s0 = scalar_lea.sflag [#allocation3], %s201_s8  ;;  %s818_s7 = scalar_lea.vmem %s212_s29, 4096 }
  0x2c   : > { %p819_p12 = scmp.ne.s32.totalorder %s212_s29, %s818_s7  ;;  %s978_s13 = smov [#allocation7]  }
  0x2d   : > { %s210_s30 = scalar_lea.hbm %s1278_s2, %s1266_s22  ;;  %s823_s14 = sshll.u32 %s978_s13, 4  ;;  %s824_s14 = int_to_ptr.vmem [resolvable:$false] %s823_s14 }
  0x2e   : > { %p821_p6 = pnand %p819_p12, %p807_p9  ;;  %s825_s23 = scalar_lea.vmem %s824_s14, 8192 }
  0x2f   : > { %p826_p5 = scmp.lt.s32.totalorder %s212_s29, %s824_s14  ;;  %p827_p1 = scmp.lt.s32.totalorder %s825_s23, %s818_s7 }
  0x30   : > { %p822_p11 = pneg %p821_p6 }
  0x31   : > { %p828_p0 = por %p827_p1, %p826_p5 }
  0x33   : > { %p829_p8 = pnand %p828_p0, %p822_p11 }
  0x35   : > { %832 = shalt.err (!%p829_p8)
}
  0x36   : > { %s979_s24 = smov 256   ;;  %s980_s8 = smov 128  }
  0x37   : > { %s981_s10 = smov 8   ;;  %s982_s11 = smov [#allocation5]  }
  0x38   : > { %710 = dma.hbm_to_vmem [thread:$0]  (!%p1084_p4), %s210_s30, 4096, %s212_s29, %s1124_s0, %s979_s24, %s980_s8, %s981_s10  }
  0x39   : > { %s190_s22 = sshll.u32 %s982_s11, 4  ;;  %s629_s13 = sshll.u32 %s203_s12, 3  ;;  %s191_s22 = int_to_ptr.vmem [resolvable:$true] %s190_s22 }
  0x3a   : > { %s844_s2 = scalar_lea.vmem %s191_s22, 128  ;;  %p852_p5 = scmp.lt.s32.totalorder %s191_s22, %s191_s22 }
  0x3b   : > { %p845_p12 = scmp.ne.s32.totalorder %s191_s22, %s844_s2  ;;  %p853_p1 = scmp.lt.s32.totalorder %s844_s2, %s844_s2 }
  0x3d   : > { %p847_p6 = pnand %p845_p12, %p781_p10  ;;  %p854_p0 = por %p853_p1, %p852_p5 }
  0x3f   : > { %p848_p11 = pneg %p847_p6 }
  0x41   : > { %p855_p8 = pnand %p854_p0, %p848_p11 }
  0x43   : > { %858 = shalt.err (!%p855_p8)
}
  0x44   : > { %706 = dma.hbm_to_vmem [thread:$0]  (!%p1090_p2), %s1260_s1, 128, %s191_s22, [#allocation6]  }
  0x45   : > { %s1279_s12 = sshll.u32 %s971_s19, 7  ;;  %s225_s24 = scalar_lea.vmem [#allocation8], %s629_s13 }
  0x46   : > { %s230_s23 = scalar_lea.hbm %s1262_s3, %s1279_s12  ;;  %s232_s8 = sshll.u32 %s225_s24, 4  ;;  %s233_s8 = int_to_ptr.vmem [resolvable:$true] %s232_s8 }
  0x47   : > { %s872_s2 = scalar_lea.vmem %s233_s8, 128  ;;  %s983_s6 = smov [#allocation8]  }
  0x48   : > { %p873_p10 = scmp.ne.s32.totalorder %s233_s8, %s872_s2  ;;  %s877_s10 = sshll.u32 %s983_s6, 4  ;;  %s878_s10 = int_to_ptr.vmem [resolvable:$false] %s877_s10 }
  0x49   : > { %s879_s11 = scalar_lea.vmem %s878_s10, 256  ;;  %p880_p11 = scmp.lt.s32.totalorder %s233_s8, %s878_s10 }
  0x4a   : > { %p875_p12 = pnand %p873_p10, %p807_p9  ;;  %p881_p2 = scmp.lt.s32.totalorder %s879_s11, %s872_s2 }
  0x4c   : > { %p876_p6 = pneg %p875_p12  ;;  %p882_p5 = por %p881_p2, %p880_p11 }
  0x4e   : > { %p883_p1 = pnand %p882_p5, %p876_p6 }
  0x50   : > { %886 = shalt.err (!%p883_p1)
}
  0x51   : > { %713 = dma.hbm_to_vmem [thread:$0]  (!%p1084_p4), %s230_s23, 128, %s233_s8, %s1124_s0  }
  0x52   : > { %241 = sbr.rel (%p1075_p13) target bundleno = 342 (0x156), region = 36 }
  0x57   : > { %938 = dma.done.wait (%p99_p3), [#allocation3], 256  }
  0x58   : > { %940 = vsyncadd (%p99_p3), [#allocation3], 4294967040 }
  0x59   : > { %942 = dma.done.wait (%p99_p3), [#allocation6], 128  }
  0x5a   : > { %944 = vsyncadd (%p99_p3), [#allocation6], 4294967168  ;;  %s251_s5 = sand.u32 1, %s1043_s21   ;;  %s1167_s0 = sand.u32 1, %s959_s16  }
  0x5b   : > { %s634_s28 = sshll.u32 %s1167_s0, 8  ;;  %s252_s22 = scalar_lea.sflag [#allocation3], %s251_s5 }
  0x5c   : > { %s1170_s13 = scalar_lea.vmem [#allocation7], %s634_s28 }
  0x5d   : > { %946 = dma.done.wait (%p1060_p7), %s252_s22, 4224  }
  0x5e   : > { %948 = vsyncadd (%p1060_p7), %s252_s22, 4294963072  ;;  %v984_v0 = vmov 0.0   ;;  %vm985_vm0 = vmmov 0   ;;  %s637_s21 = sshll.u32 %s967_s18, 7  ;;  %v327_v1 = vld [vmem:[%s1170_s13 + $0xf8] sm:$0xff]  ;;  %v326_v3 = vld [vmem:[%s1170_s13 + $0xf0] sm:$0xff] }
  0x5f   : > { %681 = vmatprep.subr.mxu0 %v984_v0  ;;  %683 = vmatprep.mubr.msk.f32.mxu0 %vm985_vm0, %v984_v0  ;;  %v311_v2 = vld [vmem:[%s1170_s13 + $0x78] sm:$0xff]  ;;  %v310_v4 = vld [vmem:[%s1170_s13 + $0x70] sm:$0xff]  ;;  %v325_v5 = vld [vmem:[%s1170_s13 + $0xe8] sm:$0xff]  ;;  %s329_s25 = sshra.s32 %s637_s21, 7  ;;  %vm335_vm1 = vcmask 64512   ;;  %s635_s12 = sshll.u32 %s1167_s0, 3 }
  0x60   : > { %646 = vmatprep.subr.mxu1 %v327_v1  ;;  %v309_v6 = vld [vmem:[%s1170_s13 + $0x68] sm:$0xff]  ;;  %v324_v7 = vld [vmem:[%s1170_s13 + $0xe0] sm:$0xff]  ;;  %s638_s7 = sshll.u32 %s329_s25, 3  ;;  %v323_v9 = vld [vmem:[%s1170_s13 + $0xd8] sm:$0xff]  ;;  %s264_s30 = scalar_lea.vmem [#allocation8], %s635_s12 }
  0x61   : > { %647 = vmatpush3.msra.mxu1 %v311_v2  ;;  %v308_v8 = vld [vmem:[%s1170_s13 + $0x60] sm:$0xff]  ;;  %v307_v10 = vld [vmem:[%s1170_s13 + $0x58] sm:$0xff]  ;;  %v322_v11 = vld [vmem:[%s1170_s13 + $0xd0] sm:$0xff]  ;;  %s332_s29 = scalar_lea.vmem [#allocation2], %s638_s7  ;;  %s293_s14 = scalar_lea.vmem [#allocation9], %s635_s12 }
  0x62   : > { %648 = vmatprep.subr.mxu1 %v326_v3  ;;  %v306_v12 = vld [vmem:[%s1170_s13 + $0x50] sm:$0xff]  ;;  %v321_v13 = vld [vmem:[%s1170_s13 + $0xc8] sm:$0xff]  ;;  %v334_v17 = vld [vmem:[#allocation5] sm:$0xff]  ;;  %s498_s23 = sshll.u32 %s293_s14, 4  ;;  %s1217_s2 = scalar_lea.hbm %s1263_s4, %s637_s21  ;;  %s499_s23 = int_to_ptr.vmem [resolvable:$true] %s498_s23 }
  0x63   : > { %649 = vmatpush3.msra.mxu1 %v310_v4  ;;  %v295_v14 = vld [vmem:[#allocation2 + $0x8] sm:$0xff]  ;;  %v305_v15 = vld [vmem:[%s1170_s13 + $0x48] sm:$0xff]  ;;  %v320_v18 = vld [vmem:[%s1170_s13 + $0xc0] sm:$0xff]  ;;  %s483_s6 = scalar_lea.sflag [#allocation4], %s1167_s0  ;;  %s887_s10 = scalar_lea.vmem %s499_s23, 128 }
  0x64   : > { %650 = vmatprep.subr.mxu1 %v325_v5  ;;  %473 = vmatprep.mubr.f32.mxu1 %v295_v14  ;;  %v333_v16 = vld [vmem:[%s332_s29] sm:$0xff]  ;;  %v304_v19 = vld [vmem:[%s1170_s13 + $0x40] sm:$0xff]  ;;  %v319_v20 = vld [vmem:[%s1170_s13 + $0xb8] sm:$0xff]  ;;  %p888_p3 = scmp.ne.s32.totalorder %s499_s23, %s887_s10  ;;  %p1280_p7 = scmp.ne.s32.totalorder %s1271_s26, 0 }
  0x65   : > { %651 = vmatpush3.msra.mxu1 %v309_v6  ;;  %682 = vmatpush3.msra.mxu0 %v333_v16  ;;  %v303_v21 = vld [vmem:[%s1170_s13 + $0x38] sm:$0xff]  ;;  %v318_v22 = vld [vmem:[%s1170_s13 + $0xb0] sm:$0xff]  ;;  %v317_v24 = vld [vmem:[%s1170_s13 + $0xa8] sm:$0xff]  ;;  %s986_s11 = smov [#allocation9]  }
  0x66   : > { %652 = vmatprep.subr.mxu1 %v324_v7  ;;  %684 = vmatmul.mubr.msk.f32.vlgmr.msra.gmra.mxu0 %vm335_vm1, %v334_v17  ;;  %v302_v23 = vld [vmem:[%s1170_s13 + $0x30] sm:$0xff]  ;;  %v301_v25 = vld [vmem:[%s1170_s13 + $0x28] sm:$0xff]  ;;  %v316_v26 = vld [vmem:[%s1170_s13 + $0xa0] sm:$0xff]  ;;  %p889_p13 = pnand %p888_p3, %p1280_p7  ;;  %s891_s5 = sshll.u32 %s986_s11, 4  ;;  %s892_s5 = int_to_ptr.vmem [resolvable:$false] %s891_s5 }
  0x67   : > { %653 = vmatpush3.msra.mxu1 %v308_v8  ;;  %v300_v27 = vld [vmem:[%s1170_s13 + $0x20] sm:$0xff]  ;;  %v315_v28 = vld [vmem:[%s1170_s13 + $0x98] sm:$0xff]  ;;  %v314_v30 = vld [vmem:[%s1170_s13 + $0x90] sm:$0xff]  ;;  %s893_s28 = scalar_lea.vmem %s892_s5, 256  ;;  %p894_p9 = scmp.lt.s32.totalorder %s499_s23, %s892_s5 }
  0x68   : > { %654 = vmatprep.subr.mxu1 %v323_v9  ;;  %v299_v29 = vld [vmem:[%s1170_s13 + $0x18] sm:$0xff]  ;;  %v298_v31 = vld [vmem:[%s1170_s13 + $0x10] sm:$0xff]  ;;  %v313_v32 = vld [vmem:[%s1170_s13 + $0x88] sm:$0xff]  ;;  %p890_p4 = pneg %p889_p13  ;;  %p895_p0 = scmp.lt.s32.totalorder %s893_s28, %s887_s10 }
  0x69   : > { %655 = vmatpush3.msra.mxu1 %v307_v10  ;;  %v297_v33 = vld [vmem:[%s1170_s13 + $0x8] sm:$0xff]  ;;  %v312_v34 = vld [vmem:[%s1170_s13 + $0x80] sm:$0xff] }
  0x6a   : > { %656 = vmatprep.subr.mxu1 %v322_v11  ;;  %v296_v35 = vld [vmem:[%s1170_s13] sm:$0xff]  ;;  %v294_v36 = vld [vmem:[#allocation2] sm:$0xff]  ;;  %p896_p8 = por %p895_p0, %p894_p9 }
  0x6b   : > { %657 = vmatpush3.msra.mxu1 %v306_v12  ;;  %v479_v42 = vld [vmem:[%s264_s30] sm:$0xff] }
  0x6c   : > { %658 = vmatprep.subr.mxu1 %v321_v13  ;;  %p897_p10 = pnand %p896_p8, %p890_p4 }
  0x6d   : > { %659 = vmatpush3.msra.mxu1 %v305_v15 }
  0x6e   : > { %660 = vmatprep.subr.mxu1 %v320_v18 }
  0x6f   : > { %661 = vmatpush3.msra.mxu1 %v304_v19 }
  0x70   : > { %662 = vmatprep.subr.mxu1 %v319_v20 }
  0x71   : > { %663 = vmatpush3.msra.mxu1 %v303_v21 }
  0x72   : > { %664 = vmatprep.subr.mxu1 %v318_v22 }
  0x73   : > { %665 = vmatpush3.msra.mxu1 %v302_v23 }
  0x74   : > { %666 = vmatprep.subr.mxu1 %v317_v24 }
  0x75   : > { %667 = vmatpush3.msra.mxu1 %v301_v25 }
  0x76   : > { %668 = vmatprep.subr.mxu1 %v316_v26 }
  0x77   : > { %669 = vmatpush3.msra.mxu1 %v300_v27 }
  0x78   : > { %670 = vmatprep.subr.mxu1 %v315_v28 }
  0x79   : > { %671 = vmatpush3.msra.mxu1 %v299_v29 }
  0x7a   : > { %672 = vmatprep.subr.mxu1 %v314_v30 }
  0x7b   : > { %673 = vmatpush3.msra.mxu1 %v298_v31 }
  0x7c   : > { %674 = vmatprep.subr.mxu1 %v313_v32 }
  0x7d   : > { %675 = vmatpush3.msra.mxu1 %v297_v33 }
  0x7e   : > { %676 = vmatprep.subr.mxu1 %v312_v34 }
  0x7f   : > { %677 = vmatpush3.msra.mxu1 %v296_v35 }
  0x80   : > { %474 = vmatmul.mubr.f32.vlgmr.msra.gmra.mxu1 %v294_v36 }
 0x126   : > { %v405_v37 = vpop.f32.mrf.mxu0 }
 0x128   : > { %v685_v38 = vpop.f32.mrf.mxu0 }
 0x140   : > { %v678_v39 = vpop.f32.mrf.mxu1 }
 0x142   : > { %v679_v40 = vpop.f32.mrf.mxu1 }
 0x143   : > { %v680_v41 = vadd.f32 %v679_v40, %v678_v39 }
 0x145   : > { %v476_v43 = vadd.f32 %v680_v41, %v405_v37 }
 0x147   : > { %v480_v44 = vadd.f32 %v479_v42, %v476_v43 }
 0x149   : > { %481 = vst [vmem:[%s293_s14] sm:$0xff] %v480_v44 }
 0x14a   : > { %900 = shalt.err (!%p897_p10)
}
 0x14b   : > { %s901_s18 = scalar_lea.hbm %s1217_s2, 128  ;;  %s905_s13 = scalar_lea.hbm %s1263_s4, 256 }
 0x14c   : > { %p902_p12 = scmp.ne.s32.totalorder %s1217_s2, %s901_s18  ;;  %p906_p2 = scmp.lt.s32.totalorder %s1217_s2, %s1263_s4 }
 0x14d   : > { %p907_p5 = scmp.lt.s32.totalorder %s905_s13, %s901_s18 }
 0x14e   : > { %p903_p6 = pnand %p902_p12, %p1280_p7 }
 0x14f   : > { %p908_p1 = por %p907_p5, %p906_p2 }
 0x150   : > { %p904_p11 = pneg %p903_p6 }
 0x152   : > { %p909_p3 = pnand %p908_p1, %p904_p11 }
 0x154   : > { %912 = shalt.err (!%p909_p3)
}
 0x155   : > { %698 = dma.vmem_to_hbm [thread:$0]  (%p1280_p7), %s499_s23, 128, %s1217_s2, %s483_s6  }
 0x156 PF: > { %s510_s7 = sand.u32 1, %s955_s15   ;;  %p1281_p13 = scmp.ne.s32.totalorder %s1272_s27, 0 }
 0x157   : > { %p1282_p4 = scmp.ge.s32.totalorder %s975_s20, 2  ;;  %s511_s29 = scalar_lea.sflag [#allocation4], %s510_s7 }
 0x159   : > { %p715_p9 = pnand %p1282_p4, %p1281_p13 }
 0x15b   : > { %p716_p0 = pneg %p715_p9 }
 0x15d   : > { %950 = dma.done.wait (%p716_p0), %s511_s29, 128  }
 0x15e   : > { %952 = vsyncadd (%p716_p0), %s511_s29, 4294967168  ;;  %s19_s20 = sadd.s32 1, %s975_s20   ;;  %s1283_s26 = sld [smem:[#allocation14_spill]] }
 0x15f   : > { %p16_p8 = scmp.ge.s32.totalorder %s19_s20, 4   ;;  %s1284_s15 = smov %s959_s16 }
 0x160   : > { %s1285_s16 = smov %s963_s17  ;;  %s1286_s17 = smov %s1117_s9 }
 0x161   : > { %s1287_s18 = smov %s971_s19  ;;  %18 = sbr.rel (!%p16_p8) target bundleno = 9 (0x9), region = 101 }
 0x164   : > { %s1288_s19 = smov %s1283_s26 }
 0x166   :  { %516 = vsyncpa [#allocation3], 1 }
 0x167   :  { %518 = vsyncpa [#allocation3 + $0x1], 1 }
 0x168   :  { %519 = vsyncpa [#allocation6], 1 }
 0x169   :  { %520 = vsyncpa [#allocation4], 1 }
 0x16a   :  { %522 = vsyncpa [#allocation4 + $0x1], 1 }

// kernel: tpu_custom_call.1
= control target key start
LH: loop header
LB: loop body
LE: loop exit
PB: predicated region body
PF: predicated region fallthrough
CT: control target
= control target key end

     0   :  { %s1259_s0 = inlined_call_operand.hbm [shape: f32[8,256], index: 0, kind: input, shape index: {}]   ;;  %s1260_s1 = inlined_call_operand.hbm [shape: f32[8,8], index: 1, kind: input, shape index: {}]   ;;  %s1261_s2 = inlined_call_operand.hbm [shape: f32[256,256], index: 2, kind: input, shape index: {}]   ;;  %s1262_s3 = inlined_call_operand.hbm [shape: f32[8,256], index: 3, kind: input, shape index: {}]   ;;  %s1263_s4 = inlined_call_operand.hbm [shape: f32[8,256], index: 4, kind: output, shape index: {}]  }
   0x1   :  { %1267 = sst [smem:[#allocation15_spill]] %s1259_s0 }
   0x2   :  { %1268 = sst [smem:[#allocation16_spill]] %s1261_s2 }
   0x3   :  { %9 = vsyncpa [#allocation3], 0 }
   0x4   :  { %10 = vsyncpa [#allocation6], 0 }
   0x5   :  { %11 = vsyncpa [#allocation4], 0 }
   0x6   :  { %13 = vsyncpa [#allocation4 + $0x1], 0  ;;  %s1012_s15 = smov 0   ;;  %s1014_s16 = smov 0  }
   0x7   :  { %s1016_s17 = smov 0   ;;  %s1018_s18 = smov 0  }
   0x8   :  { %s1020_s19 = smov 0   ;;  %s1022_s20 = smov 0  }
   0x9 LB: > { %s1043_s21 = sadd.s32 4294967295, %s975_s20   ;;  %s622_s22 = sadd.s32 4294967294, %s975_s20   ;;  %s975_s20 = sphi %s1022_s20, %s19_s20   ;;  %s971_s19 = sphi %s1020_s19, %s1288_s19   ;;  %s967_s18 = sphi %s1018_s18, %s1287_s18   ;;  %s963_s17 = sphi %s1016_s17, %s1286_s17   ;;  %s959_s16 = sphi %s1014_s16, %s1285_s16   ;;  %s955_s15 = sphi %s1012_s15, %s1284_s15  }
   0xa   : > { %s85_s23 = sadd.s32 1, %s963_s17  ;;  %p92_p0 = scmp.ne.s32.totalorder %s963_s17, %s959_s16 }
   0xb   : > { %p93_p1 = scmp.eq.s32.totalorder %s975_s20, 0  ;;  %p98_p2 = scmp.ne.s32.totalorder %s959_s16, %s955_s15 }
   0xc   : > { %p99_p3 = scmp.eq.s32.totalorder %s1043_s21, 0  ;;  %p150_p4 = scmp.eq.s32.totalorder %s1043_s21, 1 }
   0xd   : > { %p1054_p5 = por %p93_p1, %p92_p0  ;;  %p156_p6 = scmp.eq.s32.totalorder %s622_s22, 1 }
   0xe   : > { %p1060_p7 = por %p99_p3, %p98_p2  ;;  %p1064_p8 = por %p150_p4, %p92_p0 }
   0xf   : > { %p1068_p9 = por %p156_p6, %p98_p2  ;;  %p623_p10 = scmp.ge.s32.totalorder %s975_s20, 1 }
  0x10   : > { %s1271_s26 = scalar_select %p1064_p8, 1, 0 }
  0x11   : > { %s1272_s27 = scalar_select %p1068_p9, 1, 0 }
  0x12   : > { %p163_p11 = scmp.lt.s32.totalorder %s975_s20, 3  ;;  %s977_s29 = smov [#allocation2]  }
  0x13   : > { %s179_s30 = sshll.u32 %s977_s29, 4  ;;  %p720_p1 = scmp.lt.s32.totalorder %s975_s20, 2  ;;  %s180_s30 = int_to_ptr.vmem [resolvable:$true] %s179_s30 }
  0x14   : > { %p1075_p13 = pnand %p623_p10, %p163_p11  ;;  %s28_s7 = sadd.s32 1, %s971_s19 }
  0x15   : > { %p1084_p4 = pnand %p720_p1, %p1054_p5  ;;  %p29_p6 = scmp.ge.s32.totalorder %s28_s7, 2 }
  0x16   : > { %p700_p0 = pneg %p1075_p13  ;;  %s201_s8 = sand.u32 1, %s975_s20  }
  0x17   : > { %s790_s9 = scalar_lea.vmem %s180_s30, 256  ;;  %p798_p12 = scmp.lt.s32.totalorder %s180_s30, %s180_s30 }
  0x18   : > { %p1090_p2 = pnand %p700_p0, %p99_p3  ;;  %p791_p11 = scmp.ne.s32.totalorder %s180_s30, %s790_s9 }
  0x19   : > { %p799_p9 = scmp.lt.s32.totalorder %s790_s9, %s790_s9 }
  0x1a   : > { %p781_p10 = pneg %p1090_p2 }
  0x1b   : > { %p800_p8 = por %p799_p9, %p798_p12 }
  0x1c   : > { %p793_p5 = pnand %p791_p11, %p781_p10 }
  0x1e   : > { %p794_p1 = pneg %p793_p5 }
  0x20   : > { %p801_p0 = pnand %p800_p8, %p794_p1 }
  0x22   : > { %804 = shalt.err (!%p801_p0)
}
  0x23   : > { %s1276_s0 = sld [smem:[#allocation15_spill]]  ;;  %s1290_s7 = smov (%p29_p6, %s28_s7), 0 }
  0x24   : > { %1277 = sst [smem:[#allocation14_spill]] %s1290_s7  ;;  %s203_s12 = sand.u32 1, %s963_s17  }
  0x25   : > { %s82_s13 = ssub.s32 %s971_s19, %s1290_s7  ;;  %s627_s14 = sshll.u32 %s203_s12, 8 }
  0x26   : > { %p83_p8 = scmp.eq.s32.totalorder %s82_s13, 0  ;;  %s1266_s22 = sshll.u32 %s971_s19, 7 }
  0x27   : > { %s205_s24 = scalar_lea.vmem [#allocation7], %s627_s14  ;;  %s1278_s2 = sld [smem:[#allocation16_spill]] }
  0x28   : > { %s211_s29 = sshll.u32 %s205_s24, 4  ;;  %p807_p9 = pneg %p1084_p4  ;;  %s212_s29 = int_to_ptr.vmem [resolvable:$true] %s211_s29 }
  0x29   : > { %703 = dma.hbm_to_vmem [thread:$0]  (!%p1090_p2), %s1276_s0, 256, %s180_s30, [#allocation3]  }
  0x2a   : > { %s1117_s9 = scalar_select %p83_p8, %s963_s17, %s85_s23  }
  0x2b   : > { %s1124_s0 = scalar_lea.sflag [#allocation3], %s201_s8  ;;  %s818_s7 = scalar_lea.vmem %s212_s29, 4096 }
  0x2c   : > { %p819_p12 = scmp.ne.s32.totalorder %s212_s29, %s818_s7  ;;  %s978_s13 = smov [#allocation7]  }
  0x2d   : > { %s210_s30 = scalar_lea.hbm %s1278_s2, %s1266_s22  ;;  %s823_s14 = sshll.u32 %s978_s13, 4  ;;  %s824_s14 = int_to_ptr.vmem [resolvable:$false] %s823_s14 }
  0x2e   : > { %p821_p6 = pnand %p819_p12, %p807_p9  ;;  %s825_s23 = scalar_lea.vmem %s824_s14, 8192 }
  0x2f   : > { %p826_p5 = scmp.lt.s32.totalorder %s212_s29, %s824_s14  ;;  %p827_p1 = scmp.lt.s32.totalorder %s825_s23, %s818_s7 }
  0x30   : > { %p822_p11 = pneg %p821_p6 }
  0x31   : > { %p828_p0 = por %p827_p1, %p826_p5 }
  0x33   : > { %p829_p8 = pnand %p828_p0, %p822_p11 }
  0x35   : > { %832 = shalt.err (!%p829_p8)
}
  0x36   : > { %s979_s24 = smov 256   ;;  %s980_s8 = smov 128  }
  0x37   : > { %s981_s10 = smov 8   ;;  %s982_s11 = smov [#allocation5]  }
  0x38   : > { %710 = dma.hbm_to_vmem [thread:$0]  (!%p1084_p4), %s210_s30, 4096, %s212_s29, %s1124_s0, %s979_s24, %s980_s8, %s981_s10  }
  0x39   : > { %s190_s22 = sshll.u32 %s982_s11, 4  ;;  %s629_s13 = sshll.u32 %s203_s12, 3  ;;  %s191_s22 = int_to_ptr.vmem [resolvable:$true] %s190_s22 }
  0x3a   : > { %s844_s2 = scalar_lea.vmem %s191_s22, 128  ;;  %p852_p5 = scmp.lt.s32.totalorder %s191_s22, %s191_s22 }
  0x3b   : > { %p845_p12 = scmp.ne.s32.totalorder %s191_s22, %s844_s2  ;;  %p853_p1 = scmp.lt.s32.totalorder %s844_s2, %s844_s2 }
  0x3d   : > { %p847_p6 = pnand %p845_p12, %p781_p10  ;;  %p854_p0 = por %p853_p1, %p852_p5 }
  0x3f   : > { %p848_p11 = pneg %p847_p6 }
  0x41   : > { %p855_p8 = pnand %p854_p0, %p848_p11 }
  0x43   : > { %858 = shalt.err (!%p855_p8)
}
  0x44   : > { %706 = dma.hbm_to_vmem [thread:$0]  (!%p1090_p2), %s1260_s1, 128, %s191_s22, [#allocation6]  }
  0x45   : > { %s1279_s12 = sshll.u32 %s971_s19, 7  ;;  %s225_s24 = scalar_lea.vmem [#allocation8], %s629_s13 }
  0x46   : > { %s230_s23 = scalar_lea.hbm %s1262_s3, %s1279_s12  ;;  %s232_s8 = sshll.u32 %s225_s24, 4  ;;  %s233_s8 = int_to_ptr.vmem [resolvable:$true] %s232_s8 }
  0x47   : > { %s872_s2 = scalar_lea.vmem %s233_s8, 128  ;;  %s983_s6 = smov [#allocation8]  }
  0x48   : > { %p873_p10 = scmp.ne.s32.totalorder %s233_s8, %s872_s2  ;;  %s877_s10 = sshll.u32 %s983_s6, 4  ;;  %s878_s10 = int_to_ptr.vmem [resolvable:$false] %s877_s10 }
  0x49   : > { %s879_s11 = scalar_lea.vmem %s878_s10, 256  ;;  %p880_p11 = scmp.lt.s32.totalorder %s233_s8, %s878_s10 }
  0x4a   : > { %p875_p12 = pnand %p873_p10, %p807_p9  ;;  %p881_p2 = scmp.lt.s32.totalorder %s879_s11, %s872_s2 }
  0x4c   : > { %p876_p6 = pneg %p875_p12  ;;  %p882_p5 = por %p881_p2, %p880_p11 }
  0x4e   : > { %p883_p1 = pnand %p882_p5, %p876_p6 }
  0x50   : > { %886 = shalt.err (!%p883_p1)
}
  0x51   : > { %713 = dma.hbm_to_vmem [thread:$0]  (!%p1084_p4), %s230_s23, 128, %s233_s8, %s1124_s0  }
  0x52   : > { %241 = sbr.rel (%p1075_p13) target bundleno = 342 (0x156), region = 36 }
  0x57   : > { %938 = dma.done.wait (%p99_p3), [#allocation3], 256  }
  0x58   : > { %940 = vsyncadd (%p99_p3), [#allocation3], 4294967040 }
  0x59   : > { %942 = dma.done.wait (%p99_p3), [#allocation6], 128  }
  0x5a   : > { %944 = vsyncadd (%p99_p3), [#allocation6], 4294967168  ;;  %s251_s5 = sand.u32 1, %s1043_s21   ;;  %s1167_s0 = sand.u32 1, %s959_s16  }
  0x5b   : > { %s634_s28 = sshll.u32 %s1167_s0, 8  ;;  %s252_s22 = scalar_lea.sflag [#allocation3], %s251_s5 }
  0x5c   : > { %s1170_s13 = scalar_lea.vmem [#allocation7], %s634_s28 }
  0x5d   : > { %946 = dma.done.wait (%p1060_p7), %s252_s22, 4224  }
  0x5e   : > { %948 = vsyncadd (%p1060_p7), %s252_s22, 4294963072  ;;  %v984_v0 = vmov 0.0   ;;  %vm985_vm0 = vmmov 0   ;;  %s637_s21 = sshll.u32 %s967_s18, 7  ;;  %v327_v1 = vld [vmem:[%s1170_s13 + $0xf8] sm:$0xff]  ;;  %v326_v3 = vld [vmem:[%s1170_s13 + $0xf0] sm:$0xff] }
  0x5f   : > { %681 = vmatprep.subr.mxu0 %v984_v0  ;;  %683 = vmatprep.mubr.msk.f32.mxu0 %vm985_vm0, %v984_v0  ;;  %v311_v2 = vld [vmem:[%s1170_s13 + $0x78] sm:$0xff]  ;;  %v310_v4 = vld [vmem:[%s1170_s13 + $0x70] sm:$0xff]  ;;  %v325_v5 = vld [vmem:[%s1170_s13 + $0xe8] sm:$0xff]  ;;  %s329_s25 = sshra.s32 %s637_s21, 7  ;;  %vm335_vm1 = vcmask 64512   ;;  %s635_s12 = sshll.u32 %s1167_s0, 3 }
  0x60   : > { %646 = vmatprep.subr.mxu1 %v327_v1  ;;  %v309_v6 = vld [vmem:[%s1170_s13 + $0x68] sm:$0xff]  ;;  %v324_v7 = vld [vmem:[%s1170_s13 + $0xe0] sm:$0xff]  ;;  %s638_s7 = sshll.u32 %s329_s25, 3  ;;  %v323_v9 = vld [vmem:[%s1170_s13 + $0xd8] sm:$0xff]  ;;  %s264_s30 = scalar_lea.vmem [#allocation8], %s635_s12 }
  0x61   : > { %647 = vmatpush3.msra.mxu1 %v311_v2  ;;  %v308_v8 = vld [vmem:[%s1170_s13 + $0x60] sm:$0xff]  ;;  %v307_v10 = vld [vmem:[%s1170_s13 + $0x58] sm:$0xff]  ;;  %v322_v11 = vld [vmem:[%s1170_s13 + $0xd0] sm:$0xff]  ;;  %s332_s29 = scalar_lea.vmem [#allocation2], %s638_s7  ;;  %s293_s14 = scalar_lea.vmem [#allocation9], %s635_s12 }
  0x62   : > { %648 = vmatprep.subr.mxu1 %v326_v3  ;;  %v306_v12 = vld [vmem:[%s1170_s13 + $0x50] sm:$0xff]  ;;  %v321_v13 = vld [vmem:[%s1170_s13 + $0xc8] sm:$0xff]  ;;  %v334_v17 = vld [vmem:[#allocation5] sm:$0xff]  ;;  %s498_s23 = sshll.u32 %s293_s14, 4  ;;  %s1217_s2 = scalar_lea.hbm %s1263_s4, %s637_s21  ;;  %s499_s23 = int_to_ptr.vmem [resolvable:$true] %s498_s23 }
  0x63   : > { %649 = vmatpush3.msra.mxu1 %v310_v4  ;;  %v295_v14 = vld [vmem:[#allocation2 + $0x8] sm:$0xff]  ;;  %v305_v15 = vld [vmem:[%s1170_s13 + $0x48] sm:$0xff]  ;;  %v320_v18 = vld [vmem:[%s1170_s13 + $0xc0] sm:$0xff]  ;;  %s483_s6 = scalar_lea.sflag [#allocation4], %s1167_s0  ;;  %s887_s10 = scalar_lea.vmem %s499_s23, 128 }
  0x64   : > { %650 = vmatprep.subr.mxu1 %v325_v5  ;;  %473 = vmatprep.mubr.f32.mxu1 %v295_v14  ;;  %v333_v16 = vld [vmem:[%s332_s29] sm:$0xff]  ;;  %v304_v19 = vld [vmem:[%s1170_s13 + $0x40] sm:$0xff]  ;;  %v319_v20 = vld [vmem:[%s1170_s13 + $0xb8] sm:$0xff]  ;;  %p888_p3 = scmp.ne.s32.totalorder %s499_s23, %s887_s10  ;;  %p1280_p7 = scmp.ne.s32.totalorder %s1271_s26, 0 }
  0x65   : > { %651 = vmatpush3.msra.mxu1 %v309_v6  ;;  %682 = vmatpush3.msra.mxu0 %v333_v16  ;;  %v303_v21 = vld [vmem:[%s1170_s13 + $0x38] sm:$0xff]  ;;  %v318_v22 = vld [vmem:[%s1170_s13 + $0xb0] sm:$0xff]  ;;  %v317_v24 = vld [vmem:[%s1170_s13 + $0xa8] sm:$0xff]  ;;  %s986_s11 = smov [#allocation9]  }
  0x66   : > { %652 = vmatprep.subr.mxu1 %v324_v7  ;;  %684 = vmatmul.mubr.msk.f32.vlgmr.msra.gmra.mxu0 %vm335_vm1, %v334_v17  ;;  %v302_v23 = vld [vmem:[%s1170_s13 + $0x30] sm:$0xff]  ;;  %v301_v25 = vld [vmem:[%s1170_s13 + $0x28] sm:$0xff]  ;;  %v316_v26 = vld [vmem:[%s1170_s13 + $0xa0] sm:$0xff]  ;;  %p889_p13 = pnand %p888_p3, %p1280_p7  ;;  %s891_s5 = sshll.u32 %s986_s11, 4  ;;  %s892_s5 = int_to_ptr.vmem [resolvable:$false] %s891_s5 }
  0x67   : > { %653 = vmatpush3.msra.mxu1 %v308_v8  ;;  %v300_v27 = vld [vmem:[%s1170_s13 + $0x20] sm:$0xff]  ;;  %v315_v28 = vld [vmem:[%s1170_s13 + $0x98] sm:$0xff]  ;;  %v314_v30 = vld [vmem:[%s1170_s13 + $0x90] sm:$0xff]  ;;  %s893_s28 = scalar_lea.vmem %s892_s5, 256  ;;  %p894_p9 = scmp.lt.s32.totalorder %s499_s23, %s892_s5 }
  0x68   : > { %654 = vmatprep.subr.mxu1 %v323_v9  ;;  %v299_v29 = vld [vmem:[%s1170_s13 + $0x18] sm:$0xff]  ;;  %v298_v31 = vld [vmem:[%s1170_s13 + $0x10] sm:$0xff]  ;;  %v313_v32 = vld [vmem:[%s1170_s13 + $0x88] sm:$0xff]  ;;  %p890_p4 = pneg %p889_p13  ;;  %p895_p0 = scmp.lt.s32.totalorder %s893_s28, %s887_s10 }
  0x69   : > { %655 = vmatpush3.msra.mxu1 %v307_v10  ;;  %v297_v33 = vld [vmem:[%s1170_s13 + $0x8] sm:$0xff]  ;;  %v312_v34 = vld [vmem:[%s1170_s13 + $0x80] sm:$0xff] }
  0x6a   : > { %656 = vmatprep.subr.mxu1 %v322_v11  ;;  %v296_v35 = vld [vmem:[%s1170_s13] sm:$0xff]  ;;  %v294_v36 = vld [vmem:[#allocation2] sm:$0xff]  ;;  %p896_p8 = por %p895_p0, %p894_p9 }
  0x6b   : > { %657 = vmatpush3.msra.mxu1 %v306_v12  ;;  %v479_v42 = vld [vmem:[%s264_s30] sm:$0xff] }
  0x6c   : > { %658 = vmatprep.subr.mxu1 %v321_v13  ;;  %p897_p10 = pnand %p896_p8, %p890_p4 }
  0x6d   : > { %659 = vmatpush3.msra.mxu1 %v305_v15 }
  0x6e   : > { %660 = vmatprep.subr.mxu1 %v320_v18 }
  0x6f   : > { %661 = vmatpush3.msra.mxu1 %v304_v19 }
  0x70   : > { %662 = vmatprep.subr.mxu1 %v319_v20 }
  0x71   : > { %663 = vmatpush3.msra.mxu1 %v303_v21 }
  0x72   : > { %664 = vmatprep.subr.mxu1 %v318_v22 }
  0x73   : > { %665 = vmatpush3.msra.mxu1 %v302_v23 }
  0x74   : > { %666 = vmatprep.subr.mxu1 %v317_v24 }
  0x75   : > { %667 = vmatpush3.msra.mxu1 %v301_v25 }
  0x76   : > { %668 = vmatprep.subr.mxu1 %v316_v26 }
  0x77   : > { %669 = vmatpush3.msra.mxu1 %v300_v27 }
  0x78   : > { %670 = vmatprep.subr.mxu1 %v315_v28 }
  0x79   : > { %671 = vmatpush3.msra.mxu1 %v299_v29 }
  0x7a   : > { %672 = vmatprep.subr.mxu1 %v314_v30 }
  0x7b   : > { %673 = vmatpush3.msra.mxu1 %v298_v31 }
  0x7c   : > { %674 = vmatprep.subr.mxu1 %v313_v32 }
  0x7d   : > { %675 = vmatpush3.msra.mxu1 %v297_v33 }
  0x7e   : > { %676 = vmatprep.subr.mxu1 %v312_v34 }
  0x7f   : > { %677 = vmatpush3.msra.mxu1 %v296_v35 }
  0x80   : > { %474 = vmatmul.mubr.f32.vlgmr.msra.gmra.mxu1 %v294_v36 }
 0x126   : > { %v405_v37 = vpop.f32.mrf.mxu0 }
 0x128   : > { %v685_v38 = vpop.f32.mrf.mxu0 }
 0x140   : > { %v678_v39 = vpop.f32.mrf.mxu1 }
 0x142   : > { %v679_v40 = vpop.f32.mrf.mxu1 }
 0x143   : > { %v680_v41 = vadd.f32 %v679_v40, %v678_v39 }
 0x145   : > { %v476_v43 = vadd.f32 %v680_v41, %v405_v37 }
 0x147   : > { %v480_v44 = vadd.f32 %v479_v42, %v476_v43 }
 0x149   : > { %481 = vst [vmem:[%s293_s14] sm:$0xff] %v480_v44 }
 0x14a   : > { %900 = shalt.err (!%p897_p10)
}
 0x14b   : > { %s901_s18 = scalar_lea.hbm %s1217_s2, 128  ;;  %s905_s13 = scalar_lea.hbm %s1263_s4, 256 }
 0x14c   : > { %p902_p12 = scmp.ne.s32.totalorder %s1217_s2, %s901_s18  ;;  %p906_p2 = scmp.lt.s32.totalorder %s1217_s2, %s1263_s4 }
 0x14d   : > { %p907_p5 = scmp.lt.s32.totalorder %s905_s13, %s901_s18 }
 0x14e   : > { %p903_p6 = pnand %p902_p12, %p1280_p7 }
 0x14f   : > { %p908_p1 = por %p907_p5, %p906_p2 }
 0x150   : > { %p904_p11 = pneg %p903_p6 }
 0x152   : > { %p909_p3 = pnand %p908_p1, %p904_p11 }
 0x154   : > { %912 = shalt.err (!%p909_p3)
}
 0x155   : > { %698 = dma.vmem_to_hbm [thread:$0]  (%p1280_p7), %s499_s23, 128, %s1217_s2, %s483_s6  }
 0x156 PF: > { %s510_s7 = sand.u32 1, %s955_s15   ;;  %p1281_p13 = scmp.ne.s32.totalorder %s1272_s27, 0 }
 0x157   : > { %p1282_p4 = scmp.ge.s32.totalorder %s975_s20, 2  ;;  %s511_s29 = scalar_lea.sflag [#allocation4], %s510_s7 }
 0x159   : > { %p715_p9 = pnand %p1282_p4, %p1281_p13 }
 0x15b   : > { %p716_p0 = pneg %p715_p9 }
 0x15d   : > { %950 = dma.done.wait (%p716_p0), %s511_s29, 128  }
 0x15e   : > { %952 = vsyncadd (%p716_p0), %s511_s29, 4294967168  ;;  %s19_s20 = sadd.s32 1, %s975_s20   ;;  %s1283_s26 = sld [smem:[#allocation14_spill]] }
 0x15f   : > { %p16_p8 = scmp.ge.s32.totalorder %s19_s20, 4   ;;  %s1284_s15 = smov %s959_s16 }
 0x160   : > { %s1285_s16 = smov %s963_s17  ;;  %s1286_s17 = smov %s1117_s9 }
 0x161   : > { %s1287_s18 = smov %s971_s19  ;;  %18 = sbr.rel (!%p16_p8) target bundleno = 9 (0x9), region = 101 }
 0x164   : > { %s1288_s19 = smov %s1283_s26 }
 0x166   :  { %516 = vsyncpa [#allocation3], 1 }
 0x167   :  { %518 = vsyncpa [#allocation3 + $0x1], 1 }
 0x168   :  { %519 = vsyncpa [#allocation6], 1 }
 0x169   :  { %520 = vsyncpa [#allocation4], 1 }
 0x16a   :  { %522 = vsyncpa [#allocation4 + $0x1], 1 }

</bundles_post_ra>
